<compile_context>
chip_gen: v7x
topology: tpu7x:2x2x1
jax: 0.10.0
libtpu: 0.0.40
codegen_flags: <defaults>
</compile_context>

<pallas_src>
import functools

import jax
import jax.numpy as jnp
from jax import lax
from jax.experimental import pallas as pl
from jax.experimental.pallas import tpu as pltpu


LANES = 512            # lane-dense slab width (multiple of 128)
MAX_TILE_ROWS = 2048   # 2048 x 512 x 4 B = 4 MiB f32 per input block
CHUNK_ROWS = 512       # in-kernel chunk (bounds elementwise temporaries)
NUM_SHARDS = 2         # leading "parallel" axis -> 2 TCs on v7x
# TODO(synk): pick NUM_SHARDS / vmem_limit per chip generation via
# pltpu.get_tpu_info() (bigger tiles on v5e/v6e's 128 MiB VMEM).


def _cdiv(a, b):
    return (a + b - 1) // b


def _round_up(v, m):
    return _cdiv(v, m) * m


def _make_kl_div_kernel(*, tile_rows, chunk_rows, tiles_per_shard,
                        total_rows, needs_mask, inv_numel):
    num_chunks = tile_rows // chunk_rows
    groups = chunk_rows // 8 if chunk_rows % 8 == 0 else None

    def kernel(x_ref, y_ref, o_ref, acc_ref):
        b = pl.program_id(1)

        @pl.when(b == 0)
        def _():
            acc_ref[...] = jnp.zeros_like(acc_ref)

        if needs_mask:
            c = pl.program_id(0)
            # Logical (unclamped) global row offset of this tile; rows at or
            # beyond total_rows (garbage / clamped-duplicate data) are masked.
            tile_row0 = (c * tiles_per_shard + b) * tile_rows

        def process(row_start):
            x = x_ref[pl.ds(row_start, chunk_rows), :].astype(jnp.float32)
            y = y_ref[pl.ds(row_start, chunk_rows), :].astype(jnp.float32)
            # Keep the where-SELECT (not a mask-multiply): log(y<=0) is
            # -inf/NaN and a multiply would propagate it.
            pred = y > 0
            if needs_mask:
                rows = lax.broadcasted_iota(jnp.int32, (chunk_rows, LANES), 0)
                pred = jnp.logical_and(
                    pred, rows + (tile_row0 + row_start) < total_rows)
            pw = jnp.where(pred, y * (jnp.log(y) - x), 0.0)
            if groups is not None and groups > 1:
                # Cross-vreg (pure VALU) fold down to one vreg-height slab.
                pw = pw.reshape(groups, 8, LANES).sum(axis=0)
            acc_ref[...] += pw

        if num_chunks == 1:
            process(0)
        else:
            def body(i, carry):
                start = pl.multiple_of(i * chunk_rows, chunk_rows)
                process(start)
                return carry
            lax.fori_loop(0, num_chunks, body, 0, unroll=True)

        @pl.when(b == pl.num_programs(1) - 1)
        def _():
            # Single small XLU reduce + fold in the 1/numel (mean) scaling.
            total = jnp.sum(acc_ref[...]) * jnp.float32(inv_numel)
            o_ref[...] = jnp.broadcast_to(total, o_ref.shape).astype(o_ref.dtype)

    return kernel


def kl_div_loss(x, y):
    """Pallas equivalent of torch.ops.aten.kl_div(x, y) with default args."""
    assert x.shape == y.shape
    numel = int(x.size)
    if numel == 0:
        return jnp.float32(float("nan"))  # torch mean over empty -> NaN

    x_flat = x.reshape(-1)
    y_flat = y.reshape(-1)

    # Only pad to the next multiple of LANES (<= 511 zeros); no tile-level
    # padding. Skipped entirely for aligned shapes.
    padded_n = _round_up(numel, LANES)
    if padded_n != numel:
        pad = padded_n - numel
        x_flat = jnp.pad(x_flat, (0, pad))
        y_flat = jnp.pad(y_flat, (0, pad))
    total_rows = padded_n // LANES
    x2 = x_flat.reshape(total_rows, LANES)
    y2 = y_flat.reshape(total_rows, LANES)

    # Tiling / sharding config (all static Python ints).
    if total_rows < 8:
        num_shards = 1
        tile_rows = total_rows          # block == full rows dim (always legal)
        chunk_rows = total_rows
    else:
        num_shards = min(NUM_SHARDS, _cdiv(total_rows, 8))
        rps = _round_up(_cdiv(total_rows, num_shards), 8)
        if rps <= CHUNK_ROWS:
            tile_rows = rps
            chunk_rows = rps
        else:
            # Multiple of CHUNK_ROWS so the in-kernel chunk loop divides
            # evenly; extra rows are masked (no extra HBM traffic).
            tile_rows = min(MAX_TILE_ROWS, _round_up(rps, CHUNK_ROWS))
            chunk_rows = CHUNK_ROWS

    tiles_total = _cdiv(total_rows, tile_rows)
    tiles_per_shard = _cdiv(tiles_total, num_shards)
    covered_rows = num_shards * tiles_per_shard * tile_rows
    needs_mask = covered_rows != total_rows
    acc_rows = 8 if chunk_rows % 8 == 0 else chunk_rows

    last_block = tiles_total - 1

    def in_map(c, b):
        # Clamp so no block starts fully out of bounds; duplicate reads from
        # clamped indices are zeroed by the in-kernel row mask.
        return (jnp.minimum(c * tiles_per_shard + b, last_block), 0)

    kernel = _make_kl_div_kernel(
        tile_rows=tile_rows,
        chunk_rows=chunk_rows,
        tiles_per_shard=tiles_per_shard,
        total_rows=total_rows,
        needs_mask=needs_mask,
        inv_numel=1.0 / numel,
    )

    # VMEM budget: 2 inputs x 2 pipeline buffers x (tile_rows*LANES*4B)
    # <= 16 MiB, + <=2 MiB chunk temporaries + 16 KiB accumulator
    # -> well inside the 32 MiB scoped limit on every generation (incl. v7x).
    partials = pl.pallas_call(
        kernel,
        out_shape=jax.ShapeDtypeStruct((num_shards, 8, 128), jnp.float32),
        grid_spec=pltpu.PrefetchScalarGridSpec(
            num_scalar_prefetch=0,
            grid=(num_shards, tiles_per_shard),
            in_specs=[
                pl.BlockSpec((tile_rows, LANES), in_map),
                pl.BlockSpec((tile_rows, LANES), in_map),
            ],
            out_specs=pl.BlockSpec((1, 8, 128), lambda c, b: (c, 0, 0)),
            scratch_shapes=[pltpu.VMEM((acc_rows, LANES), jnp.float32)],
        ),
        compiler_params=pltpu.CompilerParams(
            dimension_semantics=("parallel", "arbitrary"),
            vmem_limit_bytes=32 * 1024 * 1024,
        ),
    )(x2, y2)

    # Per-shard partials already include the 1/numel scaling.
    return jnp.sum(partials[:, 0, 0])


def kl_div_ref(x, y):
    pointwise = jnp.where(y > 0, y * (jnp.log(y) - x), 0.0)
    return jnp.sum(pointwise) / pointwise.size


if __name__ == "__main__":
    key = jax.random.PRNGKey(0)
    kx, ky = jax.random.split(key)

    B, S, D = 2, 8, 32  # small 3-D shapes consistent with ([-1, -1, -1], f32)
    # x: log-probabilities, y: probabilities (typical kl_div usage)
    x = jax.nn.log_softmax(jax.random.normal(kx, (B, S, D), jnp.float32), axis=-1)
    y = jax.nn.softmax(jax.random.normal(ky, (B, S, D), jnp.float32), axis=-1)

    result = jax.block_until_ready(kl_div_loss(x, y))
    expected = kl_div_ref(x, y)

    assert jnp.allclose(result, expected, rtol=1e-5, atol=1e-6), (result, expected)
    print("KERNEL_OK")
</pallas_src>

<mosaic_0001>
module attributes {stable_mosaic.version = 11 : i64} {
  func.func @kernel(%arg0: i32, %arg1: i32, %arg2: memref<1x512xf32, #tpu.memory_space<vmem>>, %arg3: memref<1x512xf32, #tpu.memory_space<vmem>>, %arg4: memref<1x8x128xf32, #tpu.memory_space<vmem>>, %arg5: memref<1x512xf32, #tpu.memory_space<vmem>>) attributes {dimension_semantics = [#tpu.dimension_semantics<parallel>, #tpu.dimension_semantics<arbitrary>], iteration_bounds = array<i64: 1, 1>, scalar_prefetch = 0 : i64, scratch_operands = 1 : i64, tpu.core_type = #tpu.core_type<tc>, window_params = [{transform_indices = @transform_0, window_bounds = array<i64: 1, 512>}, {transform_indices = @transform_1, window_bounds = array<i64: 1, 512>}, {transform_indices = @transform_2, window_bounds = array<i64: 1, 8, 128>}]} {
    %c0_i32 = arith.constant 0 : i32
    %0 = arith.cmpi eq, %arg1, %c0_i32 : i32
    %1 = arith.extui %0 : i1 to i32
    %c0_i32_0 = arith.constant 0 : i32
    %2 = arith.cmpi ne, %1, %c0_i32_0 : i32
    scf.if %2 {
      %cst_11 = arith.constant 0.000000e+00 : f32
      %18 = vector.broadcast %cst_11 : f32 to vector<1x512xf32>
      %c0_12 = arith.constant 0 : index
      %c0_13 = arith.constant 0 : index
      %19 = vector.load %arg5[%c0_12, %c0_13] : memref<1x512xf32, #tpu.memory_space<vmem>>, vector<1x512xf32>
      tpu.vector_store %arg5[%c0_12, %c0_13], %18 {strides = array<i32>} : memref<1x512xf32, #tpu.memory_space<vmem>>, vector<1x512xf32>,
    } else {
    }
    %c0 = arith.constant 0 : index
    %c0_1 = arith.constant 0 : index
    %3 = vector.load %arg2[%c0, %c0_1] : memref<1x512xf32, #tpu.memory_space<vmem>>, vector<1x512xf32>
    %c0_2 = arith.constant 0 : index
    %c0_3 = arith.constant 0 : index
    %4 = vector.load %arg3[%c0_2, %c0_3] : memref<1x512xf32, #tpu.memory_space<vmem>>, vector<1x512xf32>
    %cst = arith.constant 0.000000e+00 : f32
    %5 = vector.broadcast %cst : f32 to vector<1x512xf32>
    %6 = arith.cmpf ogt, %4, %5 : vector<1x512xf32>
    %7 = math.log %4 : vector<1x512xf32>
    %8 = arith.subf %7, %3 : vector<1x512xf32>
    %9 = arith.mulf %4, %8 : vector<1x512xf32>
    %cst_4 = arith.constant 0.000000e+00 : f32
    %10 = vector.broadcast %cst_4 : f32 to vector<1x512xf32>
    %11 = arith.select %6, %9, %10 : vector<1x512xi1>, vector<1x512xf32>
    %c0_5 = arith.constant 0 : index
    %c0_6 = arith.constant 0 : index
    %12 = vector.load %arg5[%c0_5, %c0_6] : memref<1x512xf32, #tpu.memory_space<vmem>>, vector<1x512xf32>
    %13 = arith.addf %12, %11 : vector<1x512xf32>
    %c0_7 = arith.constant 0 : index
    %c0_8 = arith.constant 0 : index
    %14 = vector.load %arg5[%c0_7, %c0_8] : memref<1x512xf32, #tpu.memory_space<vmem>>, vector<1x512xf32>
    tpu.vector_store %arg5[%c0_7, %c0_8], %13 {strides = array<i32>} : memref<1x512xf32, #tpu.memory_space<vmem>>, vector<1x512xf32>,
    %c0_i32_9 = arith.constant 0 : i32
    %15 = arith.cmpi eq, %arg1, %c0_i32_9 : i32
    %16 = arith.extui %15 : i1 to i32
    %c0_i32_10 = arith.constant 0 : i32
    %17 = arith.cmpi ne, %16, %c0_i32_10 : i32
    scf.if %17 {
      %c0_11 = arith.constant 0 : index
      %c0_12 = arith.constant 0 : index
      %18 = vector.load %arg5[%c0_11, %c0_12] : memref<1x512xf32, #tpu.memory_space<vmem>>, vector<1x512xf32>
      %19 = vector.shape_cast %18 : vector<1x512xf32> to vector<1x1x512xf32>
      %cst_13 = arith.constant dense<0.000000e+00> : vector<1xf32>
      %20 = vector.multi_reduction <add>, %19, %cst_13 [1, 2] : vector<1x1x512xf32> to vector<1xf32>
      %21 = vector.shape_cast %20 : vector<1xf32> to vector<1x1x1xf32>
      %22 = vector.extract %21[0, 0, 0] : f32 from vector<1x1x1xf32>
      %cst_14 = arith.constant 0.001953125 : f32
      %23 = arith.mulf %22, %cst_14 : f32
      %24 = vector.broadcast %23 : f32 to vector<1x8x128xf32>
      %c0_15 = arith.constant 0 : index
      %c0_16 = arith.constant 0 : index
      %c0_17 = arith.constant 0 : index
      %25 = vector.load %arg4[%c0_15, %c0_16, %c0_17] : memref<1x8x128xf32, #tpu.memory_space<vmem>>, vector<1x8x128xf32>
      tpu.vector_store %arg4[%c0_15, %c0_16, %c0_17], %24 {strides = array<i32>} : memref<1x8x128xf32, #tpu.memory_space<vmem>>, vector<1x8x128xf32>,
    } else {
    }
    return
  }
  func.func @transform_0(%arg0: i32, %arg1: i32) -> (i32, i32) {
    %c1_i32 = arith.constant 1 : i32
    %0 = arith.muli %arg0, %c1_i32 : i32
    %1 = arith.addi %0, %arg1 : i32
    %c0_i32 = arith.constant 0 : i32
    %2 = arith.minsi %1, %c0_i32 : i32
    %c0_i32_0 = arith.constant 0 : i32
    %c0_i32_1 = arith.constant 0 : i32
    return %2, %c0_i32_0 : i32, i32
  }
  func.func @transform_1(%arg0: i32, %arg1: i32) -> (i32, i32) {
    %c1_i32 = arith.constant 1 : i32
    %0 = arith.muli %arg0, %c1_i32 : i32
    %1 = arith.addi %0, %arg1 : i32
    %c0_i32 = arith.constant 0 : i32
    %2 = arith.minsi %1, %c0_i32 : i32
    %c0_i32_0 = arith.constant 0 : i32
    %c0_i32_1 = arith.constant 0 : i32
    return %2, %c0_i32_0 : i32, i32
  }
  func.func @transform_2(%arg0: i32, %arg1: i32) -> (i32, i32, i32) {
    %c0_i32 = arith.constant 0 : i32
    %c0_i32_0 = arith.constant 0 : i32
    %c0_i32_1 = arith.constant 0 : i32
    return %arg0, %c0_i32, %c0_i32_0 : i32, i32, i32
  }
}

</mosaic_0001>

<bundles_post_ra>
// kernel: tpu_custom_call.1
= control target key start
LH: loop header
LB: loop body
LE: loop exit
PB: predicated region body
PF: predicated region fallthrough
CT: control target
= control target key end

     0   :  { %7 = vsyncpa [#allocation4], 0  ;;  %s278_s0 = inlined_call_operand.hbm [shape: f32[1,512], index: 0, kind: input, shape index: {}]   ;;  %s279_s1 = inlined_call_operand.hbm [shape: f32[1,512], index: 1, kind: input, shape index: {}]   ;;  %s280_s2 = inlined_call_operand.hbm [shape: f32[1,8,128], index: 2, kind: output, shape index: {}]  }
   0x1   :  { %8 = vsyncpa [#allocation7], 0 }
   0x2   :  { %9 = vsyncpa [#allocation5], 0  ;;  %s223_s9 = smov [#allocation3]   ;;  %s224_s11 = smov [#allocation6]  }
   0x3   :  { %s22_s10 = sshll.u32 %s223_s9, 4  ;;  %s38_s12 = sshll.u32 %s224_s11, 4  ;;  %s23_s10 = int_to_ptr.vmem [resolvable:$true] %s22_s10  ;;  %s39_s12 = int_to_ptr.vmem [resolvable:$true] %s38_s12 }
   0x4   :  { %s151_s15 = scalar_lea.hbm %s278_s0, 64 }
   0x5   :  { %p152_p0 = scmp.ne.s32.totalorder %s278_s0, %s151_s15  ;;  %p155_p1 = scmp.lt.u32.totalorder %s151_s15, %s278_s0 }
   0x7   :  { %p157_p2 = pnand %p155_p1, %p152_p0 }
   0x9   :  { %160 = shalt.err (!%p157_p2)
}
   0xa   :  { %s161_s20 = scalar_lea.vmem %s23_s10, 64  ;;  %p166_p4 = scmp.lt.s32.totalorder %s23_s10, %s23_s10 }
   0xb   :  { %p162_p3 = scmp.ne.s32.totalorder %s23_s10, %s161_s20  ;;  %p167_p5 = scmp.lt.s32.totalorder %s161_s20, %s161_s20 }
   0xd   :  { %p168_p6 = por %p167_p5, %p166_p4 }
   0xf   :  { %p169_p7 = pnand %p168_p6, %p162_p3 }
  0x11   :  { %172 = shalt.err (!%p169_p7)
}
  0x12   :  { %25 = dma.hbm_to_vmem [thread:$0]  %s278_s0, 64, %s23_s10, [#allocation4]  }
  0x13   :  { %s173_s25 = scalar_lea.hbm %s279_s1, 64 }
  0x14   :  { %p174_p8 = scmp.ne.s32.totalorder %s279_s1, %s173_s25  ;;  %p177_p9 = scmp.lt.u32.totalorder %s173_s25, %s279_s1 }
  0x16   :  { %p179_p10 = pnand %p177_p9, %p174_p8 }
  0x18   :  { %182 = shalt.err (!%p179_p10)
}
  0x19   :  { %s183_s30 = scalar_lea.vmem %s39_s12, 64  ;;  %p188_p12 = scmp.lt.s32.totalorder %s39_s12, %s39_s12 }
  0x1a   :  { %p184_p11 = scmp.ne.s32.totalorder %s39_s12, %s183_s30  ;;  %p189_p13 = scmp.lt.s32.totalorder %s183_s30, %s183_s30 }
  0x1c   :  { %p190_p0 = por %p189_p13, %p188_p12 }
  0x1e   :  { %p191_p1 = pnand %p190_p0, %p184_p11 }
  0x20   :  { %194 = shalt.err (!%p191_p1)
}
  0x21   :  { %41 = dma.hbm_to_vmem [thread:$0]  %s279_s1, 64, %s39_s12, [#allocation7]  }
  0x22   :  { %217 = dma.done.wait [#allocation4], 64  }
  0x23   :  { %218 = vsyncadd [#allocation4], 4294967232 }
  0x24   :  { %219 = dma.done.wait [#allocation7], 64  }
  0x25   :  { %220 = vsyncadd [#allocation7], 4294967232  ;;  %v58_v0 = vlaneseq  ;;  %v225_v1 = vmov 0.0   ;;  %v64_v2 = vld [vmem:[#allocation6] sm:$0xf]  ;;  %vm103_vm2 = vcmask 1040384  }
  0x26   :  { %149 = vlog2.f32 %v64_v2  ;;  %v63_v4 = vld [vmem:[#allocation3] sm:$0xf]  ;;  %vm65_vm1 = vcmp.gt.f32.partialorder %v64_v2, 0.0  ;;  %s226_s1 = smov [#allocation8]  }
  0x27   :  { %vm60_vm0 = vcmp.lt.s32.totalorder %v58_v0, 512  ;;  %v84_v11 = vshrl.u32 %v58_v0, 7  ;;  %s129_s4 = sshll.u32 %s226_s1, 4  ;;  %s130_s4 = int_to_ptr.vmem [resolvable:$true] %s129_s4 }
  0x28   :  { %62 = vst.msk [vmem:[#allocation2] sm:$0xf] %vm60_vm0, %v225_v1  ;;  %s195_s7 = scalar_lea.vmem %s130_s4, 128  ;;  %p200_p3 = scmp.lt.s32.totalorder %s130_s4, %s130_s4 }
  0x29   :  { %v85_v12 = vsub.s32 0, %v84_v11  ;;  %v89_v13 = vsub.s32 1, %v84_v11  ;;  %v93_v14 = vsub.s32 2, %v84_v11  ;;  %v97_v15 = vsub.s32 3, %v84_v11  ;;  %p196_p2 = scmp.ne.s32.totalorder %s130_s4, %s195_s7  ;;  %p201_p4 = scmp.lt.s32.totalorder %s195_s7, %s195_s7 }
  0x2b   :  { %p202_p5 = por %p201_p4, %p200_p3 }
  0x2d   :  { %p203_p6 = pnand %p202_p5, %p196_p2 }
  0x2f   :  { %v71_v8 = vld [vmem:[#allocation2] sm:$0xf] }
  0x30   :  { %v150_v3 = vpop.eup %149 }
  0x31   :  { %v67_v5 = vmul.f32 0.6931472, %v150_v3 }
  0x33   :  { %v68_v6 = vsub.f32 %v67_v5, %v63_v4 }
  0x35   :  { %v69_v7 = vmul.f32 %v68_v6, %v64_v2 }
  0x37   :  { %v70_v9 = vsel %vm65_vm1, %v69_v7, 0.0 }
  0x38   :  { %v72_v10 = vadd.f32 %v71_v8, %v70_v9 }
  0x3a   :  { %77 = vst.msk [vmem:[#allocation2] sm:$0xf] %vm60_vm0, %v72_v10 }
  0x41   :  { %v81_v16 = vld [vmem:[#allocation2] sm:$0xf] }
  0x42   :  { %v86_v17 = vrot.slane %v81_v16, %v85_v12  ;;  %v90_v18 = vrot.slane %v81_v16, %v89_v13  ;;  %v94_v19 = vrot.slane %v81_v16, %v93_v14  ;;  %v98_v20 = vrot.slane %v81_v16, %v97_v15 }
  0x44   :  { %v104_v21 = vsel %vm103_vm2, %v86_v17, 0.0  ;;  %v105_v22 = vsel %vm103_vm2, %v90_v18, 0.0  ;;  %v107_v23 = vsel %vm103_vm2, %v94_v19, 0.0  ;;  %v109_v25 = vsel %vm103_vm2, %v98_v20, 0.0 }
  0x45   :  { %v106_v24 = vadd.f32 %v105_v22, %v104_v21 }
  0x47   :  { %v108_v26 = vadd.f32 %v107_v23, %v106_v24 }
  0x49   :  { %v110_v27 = vadd.f32 %v109_v25, %v108_v26 }
  0x4b   :  { %111 = vadd.xlane.f32.xlu0 %v110_v27 }
  0xd8   :  { %v112_v28 = vpop.xlane.xlu0 %111 }
  0xd9   :  { %v113_v29 = vrot.slane %v112_v28, 4 }
  0xdb   :  { %v114_v30 = vadd.f32 %v113_v29, %v112_v28 }
  0xdd   :  { %v115_v31 = vrot.slane %v114_v30, 2 }
  0xdf   :  { %v116_v32 = vadd.f32 %v115_v31, %v114_v30 }
  0xe1   :  { %v117_v33 = vrot.slane %v116_v32, 1 }
  0xe3   :  { %v118_v34 = vadd.f32 %v117_v33, %v116_v32 }
  0xe5   :  { %143 = vpush %v118_v34 }
 0x116   :  { %s144_s5 = spop %143 }
 0x117   :  { %s120_s6 = smul.f32 0.001953125, %s144_s5 }
 0x119   :  { %v121_v35 = vstv %s120_s6 }
 0x11a   :  { %122 = vst [vmem:[#allocation8] sm:$0xff] %v121_v35 }
 0x11b   :  { %206 = shalt.err (!%p203_p6)
}
 0x11c   :  { %s207_s10 = scalar_lea.hbm %s280_s2, 128 }
 0x11d   :  { %p208_p7 = scmp.ne.s32.totalorder %s280_s2, %s207_s10  ;;  %p211_p8 = scmp.lt.u32.totalorder %s207_s10, %s280_s2 }
 0x11f   :  { %p213_p9 = pnand %p211_p8, %p208_p7 }
 0x121   :  { %216 = shalt.err (!%p213_p9)
}
 0x122   :  { %132 = dma.vmem_to_hbm [thread:$0]  %s130_s4, 128, %s280_s2, [#allocation5]  }
 0x123   :  { %221 = dma.done.wait [#allocation5], 128  }
 0x124   :  { %222 = vsyncadd [#allocation5], 4294967168 }
 0x125   :  { %136 = vsyncpa [#allocation4], 1 }
 0x126   :  { %137 = vsyncpa [#allocation7], 1 }
 0x127   :  { %138 = vsyncpa [#allocation5], 1 }

</bundles_post_ra>
